<compile_context>
chip_gen: v7x
topology: tpu7x:2x2x1
jax: 0.10.0
libtpu: 0.0.40
codegen_flags: <defaults>
</compile_context>

<pallas_src>
import functools

import jax
import jax.numpy as jnp
from jax.experimental import pallas as pl
from jax.experimental.pallas import tpu as pltpu

LN_EPS = 1e-5  # PyTorch nn.LayerNorm default


def _round_up(n, m):
    return ((n + m - 1) // m) * m


def _layer_norm(x, gamma, beta):
    mu = jnp.mean(x, axis=-1, keepdims=True)
    var = jnp.mean((x - mu) ** 2, axis=-1, keepdims=True)
    return (x - mu) * jax.lax.rsqrt(var + LN_EPS) * gamma + beta


def encoder_stack_kernel(x_ref, wqkv_ref, wproj_ref, w1_ref, w2_ref, vec_ref,
                         out_x_ref, out_attn_ref,
                         *, batch, seq, num_heads, head_size, n_embd, n_hidden):
    l = pl.program_id(0)
    B, T, H, hs, D = batch, seq, num_heads, head_size, n_embd
    HS = H * hs
    BT = B * T

    # x lives in the (constant-index) output block -> resident in VMEM across
    # all layer iterations; initial load only on the first grid step.
    @pl.when(l == 0)
    def _():
        out_x_ref[...] = x_ref[...]

    x = out_x_ref[...]                                   # (B*T, D) f32

    # Packed per-layer vectors (single (8, P) block, f32).
    ln1_g = vec_ref[0:1, :D]
    ln1_b = vec_ref[1:2, :D]
    ln2_g = vec_ref[2:3, :D]
    ln2_b = vec_ref[3:4, :D]
    bproj = vec_ref[4:5, :D]
    b2 = vec_ref[5:6, :D]
    b1 = vec_ref[6:7, :n_hidden]

    # ---------------- LayerNorm 1 (f32) ----------------
    xn = _layer_norm(x, ln1_g, ln1_b)

    # ---------------- fused QKV projection (one MXU matmul) ----------------
    # C**-0.5 is already folded into the Q columns of wqkv.
    qkv = jnp.dot(xn.astype(jnp.bfloat16), wqkv_ref[...],
                  preferred_element_type=jnp.float32)    # (B*T, 3*H*hs) f32

    # ---------------- multi-head self-attention (no mask) ----------------
    def split_heads(base):
        # (B*T, hs) lane slices -> (B, H, T, hs) via a major-axis concat
        # (last two dims untouched) -> merge majors to (B*H, T, hs), bf16.
        cols = [qkv[:, base + h * hs: base + (h + 1) * hs].reshape(B, 1, T, hs)
                for h in range(H)]
        return jnp.concatenate(cols, axis=1).reshape(B * H, T, hs).astype(jnp.bfloat16)

    qh = split_heads(0)          # (B*H, T, hs)
    kh = split_heads(HS)
    vh = split_heads(2 * HS)

    # Head-batched score matmul: one einsum instead of H tiny MXU pushes.
    s = jnp.einsum('nqd,nkd->nqk', qh, kh,
                   preferred_element_type=jnp.float32)   # (B*H, T, T) f32
    s = s - jnp.max(s, axis=-1, keepdims=True)
    p = jnp.exp(s)
    p = p * pl.reciprocal(jnp.sum(p, axis=-1, keepdims=True), approx=True)

    # Only the final layer's attention maps are consumed: one bulk store in the
    # final (B, H, T, T) layout -- no concatenate, no wrapper-side transpose.
    @pl.when(l == pl.num_programs(0) - 1)
    def _():
        out_attn_ref[...] = p.reshape(B, H, T, T)

    o = jnp.einsum('nqk,nkd->nqd', p.astype(jnp.bfloat16), vh,
                   preferred_element_type=jnp.float32)   # (B*H, T, hs) f32
    o4 = o.reshape(B, H, T, hs)
    all_heads = jnp.concatenate(
        [o4[:, h].reshape(BT, hs) for h in range(H)], axis=-1)   # (B*T, H*hs)

    post_attn = jnp.dot(all_heads.astype(jnp.bfloat16), wproj_ref[...],
                        preferred_element_type=jnp.float32) + bproj
    # dropout(p=0.1) is identity in eval mode
    x = x + post_attn

    # ---------------- LayerNorm 2 + feed-forward ----------------
    xn2 = _layer_norm(x, ln2_g, ln2_b)
    h1 = jnp.maximum(jnp.dot(xn2.astype(jnp.bfloat16), w1_ref[...],
                             preferred_element_type=jnp.float32) + b1, 0.0)
    ff = jnp.dot(h1.astype(jnp.bfloat16), w2_ref[...],
                 preferred_element_type=jnp.float32) + b2
    out_x_ref[...] = x + ff                              # stays in VMEM


def prepare_stacked_params(params):
    """Pack per-layer / per-head weights into layer-stacked arrays.

    * QKV fused into a single (D, 3*H*hs) weight; the C**-0.5 attention scale
      is folded into the Q columns BEFORE the bfloat16 cast (no double round).
    * Matmul weights pre-cast to bfloat16 (halves weight DMA, feeds the MXU).
    * The 7 tiny per-layer vectors (LN params + biases) are packed into one
      f32 (L, 8, P) block (P = 128-padded) -> one DMA descriptor per layer.
    """
    blocks = params["blocks"]
    D = params["embedding"].shape[1]
    n_hidden = blocks[0]["w1"].shape[1]
    scale = D ** (-0.5)                       # PyTorch uses C**-0.5
    P = _round_up(max(D, n_hidden), 128)

    def flat(w):                              # (H, D, hs) -> (D, H*hs) head-major cols
        H, Din, hs = w.shape
        return jnp.transpose(w, (1, 0, 2)).reshape(Din, H * hs)

    def pad_row(v, n):                        # (1, n) -> (1, P)
        return jnp.pad(v, ((0, 0), (0, P - n)))

    wqkv_list, vec_list = [], []
    for b in blocks:
        wq = flat(b["wq"]) * scale            # fold scale into Q (f32)
        wqkv_list.append(jnp.concatenate([wq, flat(b["wk"]), flat(b["wv"])],
                                         axis=-1))       # (D, 3*H*hs)
        vec_list.append(jnp.concatenate([
            pad_row(b["ln1_g"], D), pad_row(b["ln1_b"], D),
            pad_row(b["ln2_g"], D), pad_row(b["ln2_b"], D),
            pad_row(b["bproj"], D), pad_row(b["b2"], D),
            pad_row(b["b1"], n_hidden),
            jnp.zeros((1, P), jnp.float32),
        ], axis=0))                                       # (8, P)

    return {
        "wqkv": jnp.stack(wqkv_list).astype(jnp.bfloat16),             # (L, D, 3*H*hs)
        "wproj": jnp.stack([b["wproj"] for b in blocks]).astype(jnp.bfloat16),
        "w1": jnp.stack([b["w1"] for b in blocks]).astype(jnp.bfloat16),
        "w2": jnp.stack([b["w2"] for b in blocks]).astype(jnp.bfloat16),
        "vecs": jnp.stack(vec_list),                                    # (L, 8, P) f32
    }


def transformer_encoder_forward(tokens, params, stacked):
    B, T = tokens.shape
    D = params["embedding"].shape[1]
    H = params["blocks"][0]["wq"].shape[0]
    hs = params["blocks"][0]["wq"].shape[2]
    n_hidden = params["blocks"][0]["w1"].shape[1]
    L = stacked["wqkv"].shape[0]
    HS = H * hs
    P = stacked["vecs"].shape[-1]
    assert T == params["pos_embedding"].shape[0], "T must equal block_size"

    # embedding lookup + positional add are glue (plain JAX)
    x = jnp.take(params["embedding"], tokens, axis=0)          # (B, T, D)
    x = x + params["pos_embedding"][None, :, :]
    x2d = x.reshape(B * T, D)

    kernel = functools.partial(encoder_stack_kernel, batch=B, seq=T,
                               num_heads=H, head_size=hs, n_embd=D,
                               n_hidden=n_hidden)

    out_x, attn = pl.pallas_call(
        kernel,
        out_shape=(jax.ShapeDtypeStruct((B * T, D), jnp.float32),
                   jax.ShapeDtypeStruct((B, H, T, T), jnp.float32)),
        grid=(L,),
        in_specs=[
            pl.BlockSpec((B * T, D), lambda l: (0, 0)),              # x (resident)
            pl.BlockSpec((None, D, 3 * HS), lambda l: (l, 0, 0)),    # fused QKV (bf16)
            pl.BlockSpec((None, HS, D), lambda l: (l, 0, 0)),        # wproj (bf16)
            pl.BlockSpec((None, D, n_hidden), lambda l: (l, 0, 0)),  # ffn w1 (bf16)
            pl.BlockSpec((None, n_hidden, D), lambda l: (l, 0, 0)),  # ffn w2 (bf16)
            pl.BlockSpec((None, 8, P), lambda l: (l, 0, 0)),         # packed LN/bias vecs
        ],
        out_specs=[
            pl.BlockSpec((B * T, D), lambda l: (0, 0)),              # x (resident)
            pl.BlockSpec((B, H, T, T), lambda l: (0, 0, 0, 0)),      # attn (last layer)
        ],
        compiler_params=pltpu.CompilerParams(
            dimension_semantics=("arbitrary",)),                     # layers are sequential
    )(x2d, stacked["wqkv"], stacked["wproj"], stacked["w1"], stacked["w2"],
      stacked["vecs"])

    return out_x.reshape(B, T, D), attn


# ---------------- pure-JAX reference (sanity check only, f32) ----------------
def reference_forward(tokens, params):
    x = jnp.take(params["embedding"], tokens, axis=0) + params["pos_embedding"][None]
    D = x.shape[-1]
    attn_maps = None
    for p in params["blocks"]:
        xn = _layer_norm(x, p["ln1_g"][0], p["ln1_b"][0])
        heads, attns = [], []
        for h in range(p["wq"].shape[0]):
            q = xn @ p["wq"][h]
            k = xn @ p["wk"][h]
            v = xn @ p["wv"][h]
            att = jax.nn.softmax(q @ jnp.swapaxes(k, -1, -2) * D ** (-0.5), axis=-1)
            attns.append(att)
            heads.append(att @ v)
        all_heads = jnp.concatenate(heads, axis=-1)
        x = x + (all_heads @ p["wproj"] + p["bproj"][0])
        xn2 = _layer_norm(x, p["ln2_g"][0], p["ln2_b"][0])
        x = x + (jnp.maximum(xn2 @ p["w1"] + p["b1"][0], 0.0) @ p["w2"] + p["b2"][0])
        attn_maps = jnp.stack(attns, axis=1)
    return x, attn_maps


def init_params(key, vocab_size, D, head_size, num_heads, num_layers,
                block_size, n_hidden):
    ks = jax.random.split(key, 2 + num_layers)
    params = {
        "embedding": 0.02 * jax.random.normal(ks[0], (vocab_size, D), jnp.float32),
        "pos_embedding": 0.02 * jax.random.normal(ks[1], (block_size, D), jnp.float32),
        "blocks": [],
    }
    for l in range(num_layers):
        bk = jax.random.split(ks[2 + l], 8)
        params["blocks"].append({
            # weights stored as (in, out) — pre-transposed vs torch (out, in)
            "wq": 0.1 * jax.random.normal(bk[0], (num_heads, D, head_size), jnp.float32),
            "wk": 0.1 * jax.random.normal(bk[1], (num_heads, D, head_size), jnp.float32),
            "wv": 0.1 * jax.random.normal(bk[2], (num_heads, D, head_size), jnp.float32),
            "wproj": 0.1 * jax.random.normal(bk[3], (num_heads * head_size, D), jnp.float32),
            "bproj": jnp.zeros((1, D), jnp.float32),
            "ln1_g": jnp.ones((1, D), jnp.float32),
            "ln1_b": jnp.zeros((1, D), jnp.float32),
            "ln2_g": jnp.ones((1, D), jnp.float32),
            "ln2_b": jnp.zeros((1, D), jnp.float32),
            "w1": 0.1 * jax.random.normal(bk[4], (D, n_hidden), jnp.float32),
            "b1": 0.01 * jax.random.normal(bk[5], (1, n_hidden), jnp.float32),
            "w2": 0.1 * jax.random.normal(bk[6], (n_hidden, D), jnp.float32),
            "b2": 0.01 * jax.random.normal(bk[7], (1, D), jnp.float32),
        })
    return params


if __name__ == "__main__":
    # small, self-consistent shapes
    vocab_size = 50
    embedding_dimension = 32
    head_size = 8
    num_heads = 4
    num_transformer_layers = 2
    block_size = 8           # T must equal block_size (positional broadcast)
    n_hidden = 64
    batch = 2

    key = jax.random.PRNGKey(0)
    params = init_params(key, vocab_size, embedding_dimension, head_size,
                         num_heads, num_transformer_layers, block_size, n_hidden)
    stacked = prepare_stacked_params(params)
    tokens = jax.random.randint(jax.random.fold_in(key, 999),
                                (batch, block_size), 0, vocab_size, dtype=jnp.int32)

    x_out, attn_out = transformer_encoder_forward(tokens, params, stacked)
    x_out = jax.block_until_ready(x_out)
    attn_out = jax.block_until_ready(attn_out)

    # loose sanity check against pure-JAX f32 reference (kernel uses bf16 MXU inputs)
    x_ref, attn_ref = reference_forward(tokens, params)
    assert x_out.shape == (batch, block_size, embedding_dimension)
    assert attn_out.shape == (batch, num_heads, block_size, block_size)
    assert jnp.allclose(x_out, x_ref, atol=2e-2, rtol=2e-2)
    assert jnp.allclose(attn_out, attn_ref, atol=2e-2, rtol=2e-2)

    print("KERNEL_OK")
</pallas_src>

<mosaic_0001>
module attributes {stable_mosaic.version = 11 : i64} {
  func.func @encoder_stack_kernel(%arg0: i32, %arg1: memref<16x32xf32, #tpu.memory_space<vmem>>, %arg2: memref<1x32x96xbf16, #tpu.memory_space<vmem>>, %arg3: memref<1x32x32xbf16, #tpu.memory_space<vmem>>, %arg4: memref<1x32x64xbf16, #tpu.memory_space<vmem>>, %arg5: memref<1x64x32xbf16, #tpu.memory_space<vmem>>, %arg6: memref<1x8x128xf32, #tpu.memory_space<vmem>>, %arg7: memref<16x32xf32, #tpu.memory_space<vmem>>, %arg8: memref<2x4x8x8xf32, #tpu.memory_space<vmem>>) attributes {dimension_semantics = [#tpu.dimension_semantics<arbitrary>], iteration_bounds = array<i64: 2>, scalar_prefetch = 0 : i64, scratch_operands = 0 : i64, tpu.core_type = #tpu.core_type<tc>, window_params = [{pipeline_mode = #tpu.pipeline_mode<synchronous>, transform_indices = @transform_0, window_bounds = array<i64: 16, 32>}, {transform_indices = @transform_1, window_bounds = array<i64: 1, 32, 96>}, {transform_indices = @transform_2, window_bounds = array<i64: 1, 32, 32>}, {transform_indices = @transform_3, window_bounds = array<i64: 1, 32, 64>}, {transform_indices = @transform_4, window_bounds = array<i64: 1, 64, 32>}, {transform_indices = @transform_5, window_bounds = array<i64: 1, 8, 128>}, {pipeline_mode = #tpu.pipeline_mode<synchronous>, transform_indices = @transform_6, window_bounds = array<i64: 16, 32>}, {pipeline_mode = #tpu.pipeline_mode<synchronous>, transform_indices = @transform_7, window_bounds = array<i64: 2, 4, 8, 8>}]} {
    %c0_i32 = arith.constant 0 : i32
    %0 = arith.cmpi eq, %arg0, %c0_i32 : i32
    %1 = arith.extui %0 : i1 to i32
    %c0_i32_0 = arith.constant 0 : i32
    %2 = arith.cmpi ne, %1, %c0_i32_0 : i32
    scf.if %2 {
      %c0_50 = arith.constant 0 : index
      %c0_51 = arith.constant 0 : index
      %152 = vector.load %arg1[%c0_50, %c0_51] : memref<16x32xf32, #tpu.memory_space<vmem>>, vector<16x32xf32>
      %c0_52 = arith.constant 0 : index
      %c0_53 = arith.constant 0 : index
      %153 = vector.load %arg7[%c0_52, %c0_53] : memref<16x32xf32, #tpu.memory_space<vmem>>, vector<16x32xf32>
      tpu.vector_store %arg7[%c0_52, %c0_53], %152 {strides = array<i32>} : memref<16x32xf32, #tpu.memory_space<vmem>>, vector<16x32xf32>,
    } else {
    }
    %c0 = arith.constant 0 : index
    %c0_1 = arith.constant 0 : index
    %3 = vector.load %arg7[%c0, %c0_1] : memref<16x32xf32, #tpu.memory_space<vmem>>, vector<16x32xf32>
    %c0_2 = arith.constant 0 : index
    %c0_3 = arith.constant 0 : index
    %c0_4 = arith.constant 0 : index
    %4 = vector.load %arg6[%c0_2, %c0_3, %c0_4] : memref<1x8x128xf32, #tpu.memory_space<vmem>>, vector<1x1x32xf32>
    %5 = vector.shape_cast %4 : vector<1x1x32xf32> to vector<1x32xf32>
    %c0_5 = arith.constant 0 : index
    %c1 = arith.constant 1 : index
    %c0_6 = arith.constant 0 : index
    %6 = vector.load %arg6[%c0_5, %c1, %c0_6] : memref<1x8x128xf32, #tpu.memory_space<vmem>>, vector<1x1x32xf32>
    %7 = vector.shape_cast %6 : vector<1x1x32xf32> to vector<1x32xf32>
    %c0_7 = arith.constant 0 : index
    %c2 = arith.constant 2 : index
    %c0_8 = arith.constant 0 : index
    %8 = vector.load %arg6[%c0_7, %c2, %c0_8] : memref<1x8x128xf32, #tpu.memory_space<vmem>>, vector<1x1x32xf32>
    %9 = vector.shape_cast %8 : vector<1x1x32xf32> to vector<1x32xf32>
    %c0_9 = arith.constant 0 : index
    %c3 = arith.constant 3 : index
    %c0_10 = arith.constant 0 : index
    %10 = vector.load %arg6[%c0_9, %c3, %c0_10] : memref<1x8x128xf32, #tpu.memory_space<vmem>>, vector<1x1x32xf32>
    %11 = vector.shape_cast %10 : vector<1x1x32xf32> to vector<1x32xf32>
    %c0_11 = arith.constant 0 : index
    %c4 = arith.constant 4 : index
    %c0_12 = arith.constant 0 : index
    %12 = vector.load %arg6[%c0_11, %c4, %c0_12] : memref<1x8x128xf32, #tpu.memory_space<vmem>>, vector<1x1x32xf32>
    %13 = vector.shape_cast %12 : vector<1x1x32xf32> to vector<1x32xf32>
    %c0_13 = arith.constant 0 : index
    %c5 = arith.constant 5 : index
    %c0_14 = arith.constant 0 : index
    %14 = vector.load %arg6[%c0_13, %c5, %c0_14] : memref<1x8x128xf32, #tpu.memory_space<vmem>>, vector<1x1x32xf32>
    %15 = vector.shape_cast %14 : vector<1x1x32xf32> to vector<1x32xf32>
    %c0_15 = arith.constant 0 : index
    %c6 = arith.constant 6 : index
    %c0_16 = arith.constant 0 : index
    %16 = vector.load %arg6[%c0_15, %c6, %c0_16] : memref<1x8x128xf32, #tpu.memory_space<vmem>>, vector<1x1x64xf32>
    %17 = vector.shape_cast %16 : vector<1x1x64xf32> to vector<1x64xf32>
    %cst = arith.constant dense<0.000000e+00> : vector<16xf32>
    %18 = vector.multi_reduction <add>, %3, %cst [1] : vector<16x32xf32> to vector<16xf32>
    %19 = vector.shape_cast %18 : vector<16xf32> to vector<16x1xf32>
    %cst_17 = arith.constant 3.200000e+01 : f32
    %20 = vector.broadcast %cst_17 : f32 to vector<16x1xf32>
    %21 = arith.divf %19, %20 : vector<16x1xf32>
    %22 = vector.broadcast %21 : vector<16x1xf32> to vector<16x32xf32>
    %23 = arith.subf %3, %22 : vector<16x32xf32>
    %24 = arith.mulf %23, %23 : vector<16x32xf32>
    %cst_18 = arith.constant dense<0.000000e+00> : vector<16xf32>
    %25 = vector.multi_reduction <add>, %24, %cst_18 [1] : vector<16x32xf32> to vector<16xf32>
    %26 = vector.shape_cast %25 : vector<16xf32> to vector<16x1xf32>
    %cst_19 = arith.constant 3.200000e+01 : f32
    %27 = vector.broadcast %cst_19 : f32 to vector<16x1xf32>
    %28 = arith.divf %26, %27 : vector<16x1xf32>
    %29 = vector.broadcast %21 : vector<16x1xf32> to vector<16x32xf32>
    %30 = arith.subf %3, %29 : vector<16x32xf32>
    %cst_20 = arith.constant 9.99999974E-6 : f32
    %31 = vector.broadcast %cst_20 : f32 to vector<16x1xf32>
    %32 = arith.addf %28, %31 : vector<16x1xf32>
    %33 = math.rsqrt %32 : vector<16x1xf32>
    %34 = vector.broadcast %33 : vector<16x1xf32> to vector<16x32xf32>
    %35 = arith.mulf %30, %34 : vector<16x32xf32>
    %36 = vector.broadcast %5 : vector<1x32xf32> to vector<16x32xf32>
    %37 = arith.mulf %35, %36 : vector<16x32xf32>
    %38 = vector.broadcast %7 : vector<1x32xf32> to vector<16x32xf32>
    %39 = arith.addf %37, %38 : vector<16x32xf32>
    %40 = arith.truncf %39 : vector<16x32xf32> to vector<16x32xbf16>
    %c0_21 = arith.constant 0 : index
    %c0_22 = arith.constant 0 : index
    %c0_23 = arith.constant 0 : index
    %41 = vector.load %arg2[%c0_21, %c0_22, %c0_23] : memref<1x32x96xbf16, #tpu.memory_space<vmem>>, vector<1x32x96xbf16>
    %42 = vector.shape_cast %41 : vector<1x32x96xbf16> to vector<32x96xbf16>
    %cst_24 = arith.constant dense<0.000000e+00> : vector<16x96xf32>
    %43 = tpu.matmul %40, %42, %cst_24 {dimension_numbers = #tpu.dot_dimension_numbers<[1], [0], [0], [1], [0, 0, 1, 1], [], []>} : vector<16x32xbf16>, vector<32x96xbf16>, vector<16x96xf32> -> vector<16x96xf32>
    %44 = vector.extract_strided_slice %43 {offsets = [0, 0], sizes = [16, 8], strides = [1, 1]} : vector<16x96xf32> to vector<16x8xf32>
    %45 = vector.shape_cast %44 : vector<16x8xf32> to vector<2x1x8x8xf32>
    %46 = vector.extract_strided_slice %43 {offsets = [0, 8], sizes = [16, 8], strides = [1, 1]} : vector<16x96xf32> to vector<16x8xf32>
    %47 = vector.shape_cast %46 : vector<16x8xf32> to vector<2x1x8x8xf32>
    %48 = vector.extract_strided_slice %43 {offsets = [0, 16], sizes = [16, 8], strides = [1, 1]} : vector<16x96xf32> to vector<16x8xf32>
    %49 = vector.shape_cast %48 : vector<16x8xf32> to vector<2x1x8x8xf32>
    %50 = vector.extract_strided_slice %43 {offsets = [0, 24], sizes = [16, 8], strides = [1, 1]} : vector<16x96xf32> to vector<16x8xf32>
    %51 = vector.shape_cast %50 : vector<16x8xf32> to vector<2x1x8x8xf32>
    %52 = tpu.concatenate %45, %47, %49, %51 in 1 : vector<2x1x8x8xf32>, vector<2x1x8x8xf32>, vector<2x1x8x8xf32>, vector<2x1x8x8xf32> -> vector<2x4x8x8xf32>
    %53 = vector.shape_cast %52 : vector<2x4x8x8xf32> to vector<8x8x8xf32>
    %54 = arith.truncf %53 : vector<8x8x8xf32> to vector<8x8x8xbf16>
    %55 = vector.extract_strided_slice %43 {offsets = [0, 32], sizes = [16, 8], strides = [1, 1]} : vector<16x96xf32> to vector<16x8xf32>
    %56 = vector.shape_cast %55 : vector<16x8xf32> to vector<2x1x8x8xf32>
    %57 = vector.extract_strided_slice %43 {offsets = [0, 40], sizes = [16, 8], strides = [1, 1]} : vector<16x96xf32> to vector<16x8xf32>
    %58 = vector.shape_cast %57 : vector<16x8xf32> to vector<2x1x8x8xf32>
    %59 = vector.extract_strided_slice %43 {offsets = [0, 48], sizes = [16, 8], strides = [1, 1]} : vector<16x96xf32> to vector<16x8xf32>
    %60 = vector.shape_cast %59 : vector<16x8xf32> to vector<2x1x8x8xf32>
    %61 = vector.extract_strided_slice %43 {offsets = [0, 56], sizes = [16, 8], strides = [1, 1]} : vector<16x96xf32> to vector<16x8xf32>
    %62 = vector.shape_cast %61 : vector<16x8xf32> to vector<2x1x8x8xf32>
    %63 = tpu.concatenate %56, %58, %60, %62 in 1 : vector<2x1x8x8xf32>, vector<2x1x8x8xf32>, vector<2x1x8x8xf32>, vector<2x1x8x8xf32> -> vector<2x4x8x8xf32>
    %64 = vector.shape_cast %63 : vector<2x4x8x8xf32> to vector<8x8x8xf32>
    %65 = arith.truncf %64 : vector<8x8x8xf32> to vector<8x8x8xbf16>
    %66 = vector.extract_strided_slice %43 {offsets = [0, 64], sizes = [16, 8], strides = [1, 1]} : vector<16x96xf32> to vector<16x8xf32>
    %67 = vector.shape_cast %66 : vector<16x8xf32> to vector<2x1x8x8xf32>
    %68 = vector.extract_strided_slice %43 {offsets = [0, 72], sizes = [16, 8], strides = [1, 1]} : vector<16x96xf32> to vector<16x8xf32>
    %69 = vector.shape_cast %68 : vector<16x8xf32> to vector<2x1x8x8xf32>
    %70 = vector.extract_strided_slice %43 {offsets = [0, 80], sizes = [16, 8], strides = [1, 1]} : vector<16x96xf32> to vector<16x8xf32>
    %71 = vector.shape_cast %70 : vector<16x8xf32> to vector<2x1x8x8xf32>
    %72 = vector.extract_strided_slice %43 {offsets = [0, 88], sizes = [16, 8], strides = [1, 1]} : vector<16x96xf32> to vector<16x8xf32>
    %73 = vector.shape_cast %72 : vector<16x8xf32> to vector<2x1x8x8xf32>
    %74 = tpu.concatenate %67, %69, %71, %73 in 1 : vector<2x1x8x8xf32>, vector<2x1x8x8xf32>, vector<2x1x8x8xf32>, vector<2x1x8x8xf32> -> vector<2x4x8x8xf32>
    %75 = vector.shape_cast %74 : vector<2x4x8x8xf32> to vector<8x8x8xf32>
    %76 = arith.truncf %75 : vector<8x8x8xf32> to vector<8x8x8xbf16>
    "tpu.trace_start"() <{level = 10 : i32, message = "nqd,nkd->nqk"}> : () -> ()
    %cst_25 = arith.constant dense<0.000000e+00> : vector<8x8x8xf32>
    %77 = tpu.matmul %54, %65, %cst_25 {dimension_numbers = #tpu.dot_dimension_numbers<[2], [2], [1], [1], [0, 0, 0, 1, 1, 1], [0], [0]>} : vector<8x8x8xbf16>, vector<8x8x8xbf16>, vector<8x8x8xf32> -> vector<8x8x8xf32>
    "tpu.trace_stop"() : () -> ()
    %cst_26 = arith.constant dense<0xFF800000> : vector<8x8xf32>
    %78 = vector.multi_reduction <maximumf>, %77, %cst_26 [2] : vector<8x8x8xf32> to vector<8x8xf32>
    %79 = vector.shape_cast %78 : vector<8x8xf32> to vector<8x8x1xf32>
    %80 = vector.broadcast %79 : vector<8x8x1xf32> to vector<8x8x8xf32>
    %81 = arith.subf %77, %80 : vector<8x8x8xf32>
    %82 = math.exp %81 : vector<8x8x8xf32>
    %cst_27 = arith.constant dense<0.000000e+00> : vector<8x8xf32>
    %83 = vector.multi_reduction <add>, %82, %cst_27 [2] : vector<8x8x8xf32> to vector<8x8xf32>
    %84 = vector.shape_cast %83 : vector<8x8xf32> to vector<8x8x1xf32>
    %85 = tpu.reciprocal %84 {approx = true} : vector<8x8x1xf32> -> vector<8x8x1xf32>
    %86 = vector.broadcast %85 : vector<8x8x1xf32> to vector<8x8x8xf32>
    %87 = arith.mulf %82, %86 : vector<8x8x8xf32>
    %c1_i32 = arith.constant 1 : i32
    %88 = arith.cmpi eq, %arg0, %c1_i32 : i32
    %89 = arith.extui %88 : i1 to i32
    %c0_i32_28 = arith.constant 0 : i32
    %90 = arith.cmpi ne, %89, %c0_i32_28 : i32
    scf.if %90 {
      %152 = vector.shape_cast %87 : vector<8x8x8xf32> to vector<2x4x8x8xf32>
      %c0_50 = arith.constant 0 : index
      %c0_51 = arith.constant 0 : index
      %c0_52 = arith.constant 0 : index
      %c0_53 = arith.constant 0 : index
      %153 = vector.load %arg8[%c0_50, %c0_51, %c0_52, %c0_53] : memref<2x4x8x8xf32, #tpu.memory_space<vmem>>, vector<2x4x8x8xf32>
      tpu.vector_store %arg8[%c0_50, %c0_51, %c0_52, %c0_53], %152 {strides = array<i32>} : memref<2x4x8x8xf32, #tpu.memory_space<vmem>>, vector<2x4x8x8xf32>,
    } else {
    }
    %91 = arith.truncf %87 : vector<8x8x8xf32> to vector<8x8x8xbf16>
    "tpu.trace_start"() <{level = 10 : i32, message = "nqk,nkd->nqd"}> : () -> ()
    %cst_29 = arith.constant dense<0.000000e+00> : vector<8x8x8xf32>
    %92 = tpu.matmul %91, %76, %cst_29 {dimension_numbers = #tpu.dot_dimension_numbers<[2], [1], [1], [2], [0, 0, 0, 1, 1, 2], [0], [0]>} : vector<8x8x8xbf16>, vector<8x8x8xbf16>, vector<8x8x8xf32> -> vector<8x8x8xf32>
    "tpu.trace_stop"() : () -> ()
    %93 = vector.shape_cast %92 : vector<8x8x8xf32> to vector<2x4x8x8xf32>
    %94 = vector.extract_strided_slice %93 {offsets = [0, 0, 0, 0], sizes = [2, 1, 8, 8], strides = [1, 1, 1, 1]} : vector<2x4x8x8xf32> to vector<2x1x8x8xf32>
    %95 = vector.shape_cast %94 : vector<2x1x8x8xf32> to vector<2x8x8xf32>
    %96 = vector.shape_cast %95 : vector<2x8x8xf32> to vector<16x8xf32>
    %97 = vector.extract_strided_slice %93 {offsets = [0, 1, 0, 0], sizes = [2, 1, 8, 8], strides = [1, 1, 1, 1]} : vector<2x4x8x8xf32> to vector<2x1x8x8xf32>
    %98 = vector.shape_cast %97 : vector<2x1x8x8xf32> to vector<2x8x8xf32>
    %99 = vector.shape_cast %98 : vector<2x8x8xf32> to vector<16x8xf32>
    %100 = vector.extract_strided_slice %93 {offsets = [0, 2, 0, 0], sizes = [2, 1, 8, 8], strides = [1, 1, 1, 1]} : vector<2x4x8x8xf32> to vector<2x1x8x8xf32>
    %101 = vector.shape_cast %100 : vector<2x1x8x8xf32> to vector<2x8x8xf32>
    %102 = vector.shape_cast %101 : vector<2x8x8xf32> to vector<16x8xf32>
    %103 = vector.extract_strided_slice %93 {offsets = [0, 3, 0, 0], sizes = [2, 1, 8, 8], strides = [1, 1, 1, 1]} : vector<2x4x8x8xf32> to vector<2x1x8x8xf32>
    %104 = vector.shape_cast %103 : vector<2x1x8x8xf32> to vector<2x8x8xf32>
    %105 = vector.shape_cast %104 : vector<2x8x8xf32> to vector<16x8xf32>
    %106 = tpu.concatenate %96, %99, %102, %105 in 1 : vector<16x8xf32>, vector<16x8xf32>, vector<16x8xf32>, vector<16x8xf32> -> vector<16x32xf32>
    %107 = arith.truncf %106 : vector<16x32xf32> to vector<16x32xbf16>
    %c0_30 = arith.constant 0 : index
    %c0_31 = arith.constant 0 : index
    %c0_32 = arith.constant 0 : index
    %108 = vector.load %arg3[%c0_30, %c0_31, %c0_32] : memref<1x32x32xbf16, #tpu.memory_space<vmem>>, vector<1x32x32xbf16>
    %109 = vector.shape_cast %108 : vector<1x32x32xbf16> to vector<32x32xbf16>
    %cst_33 = arith.constant dense<0.000000e+00> : vector<16x32xf32>
    %110 = tpu.matmul %107, %109, %cst_33 {dimension_numbers = #tpu.dot_dimension_numbers<[1], [0], [0], [1], [0, 0, 1, 1], [], []>} : vector<16x32xbf16>, vector<32x32xbf16>, vector<16x32xf32> -> vector<16x32xf32>
    %111 = vector.broadcast %13 : vector<1x32xf32> to vector<16x32xf32>
    %112 = arith.addf %110, %111 : vector<16x32xf32>
    %113 = arith.addf %3, %112 : vector<16x32xf32>
    %cst_34 = arith.constant dense<0.000000e+00> : vector<16xf32>
    %114 = vector.multi_reduction <add>, %113, %cst_34 [1] : vector<16x32xf32> to vector<16xf32>
    %115 = vector.shape_cast %114 : vector<16xf32> to vector<16x1xf32>
    %cst_35 = arith.constant 3.200000e+01 : f32
    %116 = vector.broadcast %cst_35 : f32 to vector<16x1xf32>
    %117 = arith.divf %115, %116 : vector<16x1xf32>
    %118 = vector.broadcast %117 : vector<16x1xf32> to vector<16x32xf32>
    %119 = arith.subf %113, %118 : vector<16x32xf32>
    %120 = arith.mulf %119, %119 : vector<16x32xf32>
    %cst_36 = arith.constant dense<0.000000e+00> : vector<16xf32>
    %121 = vector.multi_reduction <add>, %120, %cst_36 [1] : vector<16x32xf32> to vector<16xf32>
    %122 = vector.shape_cast %121 : vector<16xf32> to vector<16x1xf32>
    %cst_37 = arith.constant 3.200000e+01 : f32
    %123 = vector.broadcast %cst_37 : f32 to vector<16x1xf32>
    %124 = arith.divf %122, %123 : vector<16x1xf32>
    %125 = vector.broadcast %117 : vector<16x1xf32> to vector<16x32xf32>
    %126 = arith.subf %113, %125 : vector<16x32xf32>
    %cst_38 = arith.constant 9.99999974E-6 : f32
    %127 = vector.broadcast %cst_38 : f32 to vector<16x1xf32>
    %128 = arith.addf %124, %127 : vector<16x1xf32>
    %129 = math.rsqrt %128 : vector<16x1xf32>
    %130 = vector.broadcast %129 : vector<16x1xf32> to vector<16x32xf32>
    %131 = arith.mulf %126, %130 : vector<16x32xf32>
    %132 = vector.broadcast %9 : vector<1x32xf32> to vector<16x32xf32>
    %133 = arith.mulf %131, %132 : vector<16x32xf32>
    %134 = vector.broadcast %11 : vector<1x32xf32> to vector<16x32xf32>
    %135 = arith.addf %133, %134 : vector<16x32xf32>
    %136 = arith.truncf %135 : vector<16x32xf32> to vector<16x32xbf16>
    %c0_39 = arith.constant 0 : index
    %c0_40 = arith.constant 0 : index
    %c0_41 = arith.constant 0 : index
    %137 = vector.load %arg4[%c0_39, %c0_40, %c0_41] : memref<1x32x64xbf16, #tpu.memory_space<vmem>>, vector<1x32x64xbf16>
    %138 = vector.shape_cast %137 : vector<1x32x64xbf16> to vector<32x64xbf16>
    %cst_42 = arith.constant dense<0.000000e+00> : vector<16x64xf32>
    %139 = tpu.matmul %136, %138, %cst_42 {dimension_numbers = #tpu.dot_dimension_numbers<[1], [0], [0], [1], [0, 0, 1, 1], [], []>} : vector<16x32xbf16>, vector<32x64xbf16>, vector<16x64xf32> -> vector<16x64xf32>
    %140 = vector.broadcast %17 : vector<1x64xf32> to vector<16x64xf32>
    %141 = arith.addf %139, %140 : vector<16x64xf32>
    %cst_43 = arith.constant 0.000000e+00 : f32
    %142 = vector.broadcast %cst_43 : f32 to vector<16x64xf32>
    %143 = arith.maximumf %141, %142 : vector<16x64xf32>
    %144 = arith.truncf %143 : vector<16x64xf32> to vector<16x64xbf16>
    %c0_44 = arith.constant 0 : index
    %c0_45 = arith.constant 0 : index
    %c0_46 = arith.constant 0 : index
    %145 = vector.load %arg5[%c0_44, %c0_45, %c0_46] : memref<1x64x32xbf16, #tpu.memory_space<vmem>>, vector<1x64x32xbf16>
    %146 = vector.shape_cast %145 : vector<1x64x32xbf16> to vector<64x32xbf16>
    %cst_47 = arith.constant dense<0.000000e+00> : vector<16x32xf32>
    %147 = tpu.matmul %144, %146, %cst_47 {dimension_numbers = #tpu.dot_dimension_numbers<[1], [0], [0], [1], [0, 0, 1, 1], [], []>} : vector<16x64xbf16>, vector<64x32xbf16>, vector<16x32xf32> -> vector<16x32xf32>
    %148 = vector.broadcast %15 : vector<1x32xf32> to vector<16x32xf32>
    %149 = arith.addf %147, %148 : vector<16x32xf32>
    %150 = arith.addf %113, %149 : vector<16x32xf32>
    %c0_48 = arith.constant 0 : index
    %c0_49 = arith.constant 0 : index
    %151 = vector.load %arg7[%c0_48, %c0_49] : memref<16x32xf32, #tpu.memory_space<vmem>>, vector<16x32xf32>
    tpu.vector_store %arg7[%c0_48, %c0_49], %150 {strides = array<i32>} : memref<16x32xf32, #tpu.memory_space<vmem>>, vector<16x32xf32>,
    return
  }
  func.func @transform_0(%arg0: i32) -> (i32, i32) {
    %c0_i32 = arith.constant 0 : i32
    %c0_i32_0 = arith.constant 0 : i32
    %c0_i32_1 = arith.constant 0 : i32
    return %c0_i32, %c0_i32_0 : i32, i32
  }
  func.func @transform_1(%arg0: i32) -> (i32, i32, i32) {
    %c0_i32 = arith.constant 0 : i32
    %c0_i32_0 = arith.constant 0 : i32
    %c0_i32_1 = arith.constant 0 : i32
    return %arg0, %c0_i32, %c0_i32_0 : i32, i32, i32
  }
  func.func @transform_2(%arg0: i32) -> (i32, i32, i32) {
    %c0_i32 = arith.constant 0 : i32
    %c0_i32_0 = arith.constant 0 : i32
    %c0_i32_1 = arith.constant 0 : i32
    return %arg0, %c0_i32, %c0_i32_0 : i32, i32, i32
  }
  func.func @transform_3(%arg0: i32) -> (i32, i32, i32) {
    %c0_i32 = arith.constant 0 : i32
    %c0_i32_0 = arith.constant 0 : i32
    %c0_i32_1 = arith.constant 0 : i32
    return %arg0, %c0_i32, %c0_i32_0 : i32, i32, i32
  }
  func.func @transform_4(%arg0: i32) -> (i32, i32, i32) {
    %c0_i32 = arith.constant 0 : i32
    %c0_i32_0 = arith.constant 0 : i32
    %c0_i32_1 = arith.constant 0 : i32
    return %arg0, %c0_i32, %c0_i32_0 : i32, i32, i32
  }
  func.func @transform_5(%arg0: i32) -> (i32, i32, i32) {
    %c0_i32 = arith.constant 0 : i32
    %c0_i32_0 = arith.constant 0 : i32
    %c0_i32_1 = arith.constant 0 : i32
    return %arg0, %c0_i32, %c0_i32_0 : i32, i32, i32
  }
  func.func @transform_6(%arg0: i32) -> (i32, i32) {
    %c0_i32 = arith.constant 0 : i32
    %c0_i32_0 = arith.constant 0 : i32
    %c0_i32_1 = arith.constant 0 : i32
    return %c0_i32, %c0_i32_0 : i32, i32
  }
  func.func @transform_7(%arg0: i32) -> (i32, i32, i32, i32) {
    %c0_i32 = arith.constant 0 : i32
    %c0_i32_0 = arith.constant 0 : i32
    %c0_i32_1 = arith.constant 0 : i32
    %c0_i32_2 = arith.constant 0 : i32
    %c0_i32_3 = arith.constant 0 : i32
    return %c0_i32, %c0_i32_0, %c0_i32_1, %c0_i32_2 : i32, i32, i32, i32
  }
}

</mosaic_0001>

<bundles_post_ra>
// kernel: tpu_custom_call.1
= control target key start
LH: loop header
LB: loop body
LE: loop exit
PB: predicated region body
PF: predicated region fallthrough
CT: control target
= control target key end

     0   :  { %13 = vsyncpa [#allocation3], 0  ;;  %s2726_s0 = inlined_call_operand.hbm [shape: f32[16,32], index: 0, kind: input, shape index: {}]   ;;  %s2727_s1 = inlined_call_operand.vmem [shape: bf16[2,32,96], index: 1, kind: input, shape index: {}]   ;;  %s2728_s2 = inlined_call_operand.vmem [shape: bf16[2,32,32], index: 2, kind: input, shape index: {}]   ;;  %s2729_s3 = inlined_call_operand.vmem [shape: bf16[2,32,64], index: 3, kind: input, shape index: {}]   ;;  %s2730_s4 = inlined_call_operand.vmem [shape: bf16[2,64,32], index: 4, kind: input, shape index: {}]   ;;  %s2731_s5 = inlined_call_operand.vmem [shape: f32[2,8,128], index: 5, kind: input, shape index: {}]   ;;  %s2732_s6 = inlined_call_operand.hbm [shape: f32[16,32], index: 6, kind: output, shape index: {0}]   ;;  %s2733_s7 = inlined_call_operand.hbm [shape: f32[2,4,8,8], index: 7, kind: output, shape index: {1}]  }
   0x1   :  { %14 = vsyncpa [#allocation4], 0 }
   0x2   :  { %15 = vsyncpa [#allocation7], 0  ;;  %s2321_s24 = smov 0  }
   0x3 LB: > { %s2327_s25 = sadd.s32 4294967295, %s2263_s24   ;;  %p1813_p0 = scmp.ge.s32.totalorder %s2263_s24, 1  ;;  %s2263_s24 = sphi %s2321_s24, %s21_s24  }
   0x4   : > { %p219_p1 = scmp.lt.s32.totalorder %s2263_s24, 3  ;;  %s2265_s26 = smov [#allocation2]  }
   0x5   : > { %s231_s27 = sshll.u32 %s2265_s26, 4  ;;  %p2734_p4 = scmp.eq.s32.totalorder %s2327_s25, 0  ;;  %s232_s27 = int_to_ptr.vmem [resolvable:$true] %s231_s27 }
   0x6   : > { %p2332_p3 = pnand %p1813_p0, %p219_p1  ;;  %s2165_s9 = scalar_lea.hbm %s2726_s0, 256 }
   0x7   : > { %p2166_p7 = scmp.ne.s32.totalorder %s2726_s0, %s2165_s9  ;;  %p2172_p11 = scmp.lt.u32.totalorder %s2165_s9, %s2726_s0 }
   0x8   : > { %s2736_s28 = scalar_select %p2332_p3, 1, 0 }
   0x9   : > { %p2066_p5 = pneg %p2332_p3 }
   0xb   : > { %p2341_p6 = pnand %p2734_p4, %p2066_p5 }
   0xd   : > { %p2167_p8 = pneg %p2341_p6 }
   0xf   : > { %p2168_p9 = pnand %p2167_p8, %p2166_p7 }
  0x11   : > { %p2169_p10 = pneg %p2168_p9 }
  0x13   : > { %p2174_p12 = pnand %p2172_p11, %p2169_p10 }
  0x15   : > { %2177 = shalt.err (!%p2174_p12)
}
  0x16   : > { %s2178_s14 = scalar_lea.vmem %s232_s27, 256  ;;  %p2186_p5 = scmp.lt.s32.totalorder %s232_s27, %s232_s27 }
  0x17   : > { %p2179_p13 = scmp.ne.s32.totalorder %s232_s27, %s2178_s14  ;;  %p2187_p2 = scmp.lt.s32.totalorder %s2178_s14, %s2178_s14 }
  0x19   : > { %p2181_p0 = pnand %p2179_p13, %p2167_p8  ;;  %p2188_p4 = por %p2187_p2, %p2186_p5 }
  0x1b   : > { %p2182_p1 = pneg %p2181_p0 }
  0x1d   : > { %p2189_p3 = pnand %p2188_p4, %p2182_p1 }
  0x1f   : > { %2192 = shalt.err (!%p2189_p3)
}
  0x20   : > { %s2266_s15 = smov 128   ;;  %s2267_s16 = smov 8  }
  0x21   : > { %2069 = dma.hbm_to_vmem [thread:$0]  (!%p2341_p6), %s2726_s0, 256, %s232_s27, [#allocation3], %s2266_s15, %s2266_s15, %s2267_s16  }
  0x22   : > { %p2738_p7 = scmp.ne.s32.totalorder %s2736_s28, 0 }
  0x23   : > { %p2739_p9 = scmp.eq.s32.totalorder (!%p2738_p7), %s2327_s25, 0 }
  0x24   : > { %286 = sbr.rel (%p2738_p7) target bundleno = 2847 (0xb1f), region = 44 }
  0x2b   : > { %2250 = dma.done.wait (%p2739_p9), [#allocation3], 256   ;;  %p2740_p8 = pmov %p2739_p9 }
  0x2c   : > { %p332_p2 = scmp.lt.s32.totalorder %s2327_s25, 1  ;;  %p2741_p3 = scmp.ne.s32.totalorder %s2327_s25, 0 }
  0x2d   : > { %2252 = vsyncadd (%p2740_p8), [#allocation3], 4294967040  ;;  %v361_v0 = vld [vmem:[#allocation2] sm:$0xff] (!%p2741_p3)  ;;  %vm363_vm0 = vcmask (!%p2741_p3), 261120   ;;  %v362_v1 = vld [vmem:[#allocation2 + $0x8] sm:$0xff] (!%p2741_p3) }
  0x2e   : > { %s333_s19 = scalar_select %p332_p2, %s2327_s25, 1 }
  0x2f   : > { %360 = sbr.rel (%p2741_p3) target bundleno = 54 (0x36), region = 52  ;;  %364 = vst.msk [vmem:[#allocation5] sm:$0xff] (!%p2741_p3), %vm363_vm0, %v361_v0  ;;  %365 = vst.msk [vmem:[#allocation5 + $0x8] sm:$0xff] (!%p2741_p3), %vm363_vm0, %v362_v1 }
  0x30   : > { %s1872_s20 = sshll.u32 %s333_s19, 4  ;;  %s1875_s21 = sshll.u32 %s333_s19, 5 }
  0x31   : > { %s2372_s26 = scalar_lea.vmem %s2727_s1, %s1872_s20  ;;  %s2377_s29 = scalar_lea.vmem %s2728_s2, %s1872_s20 }
  0x32   : > { %s2382_s9 = scalar_lea.vmem %s2729_s3, %s1872_s20  ;;  %s2387_s12 = scalar_lea.vmem %s2730_s4, %s1875_s21 }
  0x33   : > { %s1826_s13 = sshll.u32 %s333_s19, 3 }
  0x34   : > { %s2392_s16 = scalar_lea.vmem %s2731_s5, %s1826_s13 }
  0x36 PF: > { %v2396_v2 = vld [vmem:[#allocation5] sm:$0xff]  ;;  %vm375_vm1 = vcmask 261120   ;;  %v2398_v3 = vld [vmem:[#allocation5 + $0x8] sm:$0xff]  ;;  %v2100_v16 = vld [vmem:[%s2372_s26] sm:$0xff]   ;;  %v2268_v20 = vmov 0.0   ;;  %vm2269_vm2 = vmmov 0  }
  0x37   : > { %v376_v4 = vsel %vm375_vm1, %v2396_v2, 0.0  ;;  %v379_v5 = vsel %vm375_vm1, %v2398_v3, 0.0  ;;  %v2410_v17 = vld [vmem:[%s2392_s16 + $0x2] ss:$0 sm:$0xff]  ;;  %v2413_v18 = vld [vmem:[%s2392_s16 + $0x3] ss:$0 sm:$0xff]  ;;  %1922 = vmatprep.subr.bf16.mxu0 %v2268_v20  ;;  %1930 = vmatprep.subr.bf16.mxu1 %v2268_v20 }
  0x38   : > { %377 = vadd.xlane.f32.xlu0 %v376_v4  ;;  %v2416_v19 = vld [vmem:[%s2392_s16 + $0x4] ss:$0 sm:$0xff]  ;;  %v2421_v21 = vld [vmem:[%s2392_s16 + $0x5] ss:$0 sm:$0xff]  ;;  %v2424_v22 = vld [vmem:[%s2392_s16 + $0x6] ss:$0 sm:$0xff]  ;;  %1923 = vmatpush3.bf16.msra.mxu0 %v2100_v16 }
  0x39   : > { %v2101_v23 = vld [vmem:[%s2372_s26 + $0x8] sm:$0xff]   ;;  %1924 = vmatprep.subr.bf16.mxu0 %v2268_v20  ;;  %1926 = vmatprep.mubr.msk.bf16.mxu0 %vm2269_vm2, %v2268_v20  ;;  %v1828_v32 = vld [vmem:[%s2392_s16] ss:$0 sm:$0xff]  ;;  %v1829_v36 = vld [vmem:[%s2392_s16 + $0x1] ss:$0 sm:$0xff]  ;;  %s2270_s17 = smov 112  }
  0x3a   : > { %1932 = vmatprep.mubr.msk.bf16.mxu1 %vm2269_vm2, %v2268_v20  ;;  %s2271_s18 = smov 120   ;;  %s2272_s19 = smov 104   ;;  %vm507_vm3 = vcmask 64512  }
  0x3b   : > { %s2273_s20 = smov 96   ;;  %p1841_p4 = scmp.ne.s32.totalorder %s2327_s25, 1 }
  0x3c   : > { %380 = vadd.xlane.f32.xlu0 %v379_v5  ;;  %1925 = vmatpush3.bf16.msra.mxu0 %v2101_v23 }
  0x3d   : > { %1936 = vmatprep.subr.bf16.mxu0 %v2268_v20 }
  0xc5   : > { %v378_v6 = vpop.xlane.xlu0 %377 }
  0xc6   : > { %v383_v7 = vmul.f32 0.03125, %v378_v6 }
  0xc8   : > { %v385_v8 = vsub.f32 %v2396_v2, %v383_v7 }
  0xc9   : > { %v381_v9 = vpop.xlane.xlu0 %380 }
  0xca   : > { %v384_v10 = vmul.f32 0.03125, %v381_v9  ;;  %v387_v11 = vmul.f32 %v385_v8, %v385_v8 }
  0xcc   : > { %v386_v12 = vsub.f32 %v2398_v3, %v384_v10  ;;  %v389_v13 = vsel %vm375_vm1, %v387_v11, 0.0 }
  0xcd   : > { %390 = vadd.xlane.f32.xlu1 %v389_v13 }
  0xce   : > { %v388_v14 = vmul.f32 %v386_v12, %v386_v12 }
  0xd0   : > { %v392_v15 = vsel %vm375_vm1, %v388_v14, 0.0 }
  0xd1   : > { %393 = vadd.xlane.f32.xlu1 %v392_v15 }
 0x15a   : > { %v391_v24 = vpop.xlane.xlu1 %390 }
 0x15b   : > { %v395_v25 = vmul.f32 0.03125, %v391_v24 }
 0x15d   : > { %v397_v26 = vadd.f32 1e-05, %v395_v25 }
 0x15e   : > { %v394_v27 = vpop.xlane.xlu1 %393 }
 0x15f   : > { %2102 = vrsqrt.f32 %v397_v26  ;;  %v396_v28 = vmul.f32 0.03125, %v394_v27 }
 0x161   : > { %v398_v29 = vadd.f32 1e-05, %v396_v28 }
 0x163   : > { %2104 = vrsqrt.f32 %v398_v29 }
 0x169   : > { %v2103_v30 = vpop.eup %2102 }
 0x16a   : > { %v401_v31 = vmul.f32 %v2103_v30, %v385_v8 }
 0x16c   : > { %v407_v35 = vmul.f32 %v1828_v32, %v401_v31 }
 0x16d   : > { %v2105_v33 = vpop.eup %2104 }
 0x16e   : > { %v402_v34 = vmul.f32 %v2105_v33, %v386_v12  ;;  %v413_v38 = vadd.f32 %v1829_v36, %v407_v35 }
 0x170   : > { %v408_v37 = vmul.f32 %v1828_v32, %v402_v34 }
 0x172   : > { %v414_v39 = vadd.f32 %v1829_v36, %v408_v37 }
 0x174   : > { %v415_v40 = vpack.c.bf16 %v414_v39, %v413_v38 }
 0x176   : > { %1927 = vmatmul.mubr.msk.bf16.vlgmr.msra.gmra.mrb[0].mxu0 %vm375_vm1, %v415_v40 }
 0x177   : > { %1938 = vmatprep.mubr.msk.bf16.mxu0 %vm2269_vm2, %v2268_v20 }
 0x249   : > { %v469_v41 = vpop.f32.mrb[0].mxu0 }
 0x24a   : > { %484 = vrot.lane.b32.xlu1 %v469_v41, %s2270_s17  ;;  %478 = vrot.lane.b32.xlu0 %v469_v41, %s2271_s18  ;;  %v1928_v42 = vpop.f32.mrb[1].mxu0  ;;  %v2438_v45 = vpack.c.bf16 %v469_v41, %v469_v41 }
 0x24b   : > { %v472_v43 = vpop.f32.mrb[2].mxu0 }
 0x24c   : > { %v1929_v44 = vpop.f32.mrb[3].mxu0  ;;  %v2449_v53 = vpack.c.bf16 %v472_v43, %v472_v43 }
 0x24e   : > { %490 = vrot.lane.b32.xlu1 %v469_v41, %s2272_s19  ;;  %486 = vrot.lane.b32.xlu0 %v472_v43, %s2270_s17 }
 0x252   : > { %505 = vrot.lane.b32.xlu0 %v2438_v45, %s2273_s20  ;;  %480 = vrot.lane.b32.xlu1 %v472_v43, %s2271_s18 }
 0x256   : > { %492 = vrot.lane.b32.xlu1 %v472_v43, %s2272_s19 }
 0x2bc   : > { %v485_v46 = vpop.permute.xlu1 %484  ;;  %v479_v47 = vpop.permute.xlu0 %478 }
 0x2bd   : > { %v2441_v48 = vpack.c.bf16 %v485_v46, %v485_v46  ;;  %v2443_v49 = vpack.c.bf16 %v479_v47, %v479_v47 }
 0x2bf   : > { %604 = vrot.lane.b32.xlu0 %v2441_v48, %s2273_s20  ;;  %555 = vrot.lane.b32.xlu1 %v2443_v49, %s2273_s20 }
 0x2c0   : > { %v491_v50 = vpop.permute.xlu1 %490  ;;  %v487_v51 = vpop.permute.xlu0 %486 }
 0x2c1   : > { %v2447_v52 = vpack.c.bf16 %v491_v50, %v491_v50  ;;  %v2453_v56 = vpack.c.bf16 %v487_v51, %v487_v51 }
 0x2c3   : > { %653 = vrot.lane.b32.xlu1 %v2447_v52, %s2273_s20  ;;  %702 = vrot.lane.b32.xlu0 %v2449_v53, %s2273_s20 }
 0x2c4   : > { %v506_v54 = vpop.permute.xlu0 %505  ;;  %v481_v55 = vpop.permute.xlu1 %480 }
 0x2c5   : > { %v2455_v57 = vpack.c.bf16 %v481_v55, %v481_v55  ;;  %v512_v58 = vsel %vm507_vm3, %v506_v54, 0 }
 0x2c6   : > { %1931 = vmatpush3.bf16.xpose.msra.mxu1 %v512_v58 }
 0x2c7   : > { %751 = vrot.lane.b32.xlu1 %v2455_v57, %s2273_s20  ;;  %800 = vrot.lane.b32.xlu0 %v2453_v56, %s2273_s20 }
 0x2c8   : > { %v493_v59 = vpop.permute.xlu1 %492  ;;  %1942 = vmatprep.subr.bf16.mxu1 %v2268_v20 }
 0x2c9   : > { %v2461_v60 = vpack.c.bf16 %v493_v59, %v493_v59 }
 0x2cb   : > { %849 = vrot.lane.b32.xlu1 %v2461_v60, %s2273_s20 }
 0x2cd   : > { %1933 = vmatmul.mubr.msk.bf16.vlgmr.msra.gmra.mrb[0].mxu1 %vm507_vm3, %v2438_v45 }
 0x2ce   : > { %1944 = vmatprep.mubr.msk.bf16.mxu1 %vm2269_vm2, %v2268_v20 }
 0x331   : > { %v605_v61 = vpop.permute.xlu0 %604  ;;  %v556_v62 = vpop.permute.xlu1 %555 }
 0x332   : > { %v610_v63 = vsel %vm507_vm3, %v605_v61, 0  ;;  %v561_v0 = vsel %vm507_vm3, %v556_v62, 0 }
 0x333   : > { %1937 = vmatpush3.bf16.xpose.msra.mxu0 %v561_v0  ;;  %1943 = vmatpush3.bf16.xpose.msra.mxu1 %v610_v63 }
 0x334   : > { %1948 = vmatprep.subr.bf16.mxu0 %v2268_v20  ;;  %1954 = vmatprep.subr.bf16.mxu1 %v2268_v20 }
 0x335   : > { %v654_v1 = vpop.permute.xlu1 %653  ;;  %v703_v4 = vpop.permute.xlu0 %702 }
 0x336   : > { %v659_v5 = vsel %vm507_vm3, %v654_v1, 0  ;;  %v708_v6 = vsel %vm507_vm3, %v703_v4, 0 }
 0x339   : > { %v752_v7 = vpop.permute.xlu1 %751  ;;  %v801_v8 = vpop.permute.xlu0 %800 }
 0x33a   : > { %1939 = vmatmul.mubr.msk.bf16.vlgmr.msra.gmra.mrb[4].mxu0 %vm507_vm3, %v2443_v49  ;;  %1945 = vmatmul.mubr.msk.bf16.vlgmr.msra.gmra.mrb[4].mxu1 %vm507_vm3, %v2441_v48  ;;  %v757_v9 = vsel %vm507_vm3, %v752_v7, 0  ;;  %v806_v10 = vsel %vm507_vm3, %v801_v8, 0 }
 0x33b   : > { %1949 = vmatpush3.bf16.xpose.msra.mxu0 %v659_v5  ;;  %1955 = vmatpush3.bf16.xpose.msra.mxu1 %v708_v6 }
 0x33c   : > { %1950 = vmatprep.mubr.msk.bf16.mxu0 %vm2269_vm2, %v2268_v20  ;;  %1956 = vmatprep.mubr.msk.bf16.mxu1 %vm2269_vm2, %v2268_v20 }
 0x33d   : > { %1960 = vmatprep.subr.bf16.mxu0 %v2268_v20  ;;  %1966 = vmatprep.subr.bf16.mxu1 %v2268_v20  ;;  %v850_v11 = vpop.permute.xlu1 %849 }
 0x33e   : > { %v855_v12 = vsel %vm507_vm3, %v850_v11, 0 }
 0x342   : > { %1951 = vmatmul.mubr.msk.bf16.vlgmr.msra.gmra.mrb[8].mxu0 %vm507_vm3, %v2447_v52  ;;  %1957 = vmatmul.mubr.msk.bf16.vlgmr.msra.gmra.mrb[8].mxu1 %vm507_vm3, %v2449_v53 }
 0x343   : > { %1961 = vmatpush3.bf16.xpose.msra.mxu0 %v757_v9  ;;  %1967 = vmatpush3.bf16.xpose.msra.mxu1 %v806_v10 }
 0x344   : > { %1962 = vmatprep.mubr.msk.bf16.mxu0 %vm2269_vm2, %v2268_v20  ;;  %1968 = vmatprep.mubr.msk.bf16.mxu1 %vm2269_vm2, %v2268_v20 }
 0x345   : > { %1972 = vmatprep.subr.bf16.mxu0 %v2268_v20 }
 0x34a   : > { %1963 = vmatmul.mubr.msk.bf16.vlgmr.msra.gmra.mrb[12].mxu0 %vm507_vm3, %v2455_v57  ;;  %1969 = vmatmul.mubr.msk.bf16.vlgmr.msra.gmra.mrb[12].mxu1 %vm507_vm3, %v2453_v56 }
 0x34b   : > { %1973 = vmatpush3.bf16.xpose.msra.mxu0 %v855_v12  ;;  %1974 = vmatprep.mubr.msk.bf16.mxu0 %vm2269_vm2, %v2268_v20 }
 0x352   : > { %1975 = vmatmul.mubr.msk.bf16.vlgmr.msra.gmra.mrb[16].mxu0 %vm507_vm3, %v2461_v60 }
 0x3a0   : > { %v548_v13 = vpop.f32.mrb[0].mxu1 }
 0x3a1   : > { %v1934_v14 = vpop.f32.mrb[1].mxu1  ;;  %v897_v15 = vsel %vm507_vm3, %v548_v13, -inf }
 0x3a2   : > { %v551_v16 = vpop.f32.mrb[2].mxu1  ;;  %898 = vmax.xlane.f32.xlu0 %v897_v15 }
 0x3a3   : > { %v1935_v23 = vpop.f32.mrb[3].mxu1 }
 0x40d   : > { %v597_v24 = vpop.f32.mrb[4].mxu0  ;;  %v646_v25 = vpop.f32.mrb[4].mxu1 }
 0x40e   : > { %v1940_v26 = vpop.f32.mrb[5].mxu0  ;;  %v1946_v27 = vpop.f32.mrb[5].mxu1  ;;  %v903_v28 = vsel %vm507_vm3, %v646_v25, -inf  ;;  %v900_v29 = vsel %vm507_vm3, %v597_v24, -inf }
 0x40f   : > { %v649_v30 = vpop.f32.mrb[6].mxu1  ;;  %904 = vmax.xlane.f32.xlu0 %v903_v28  ;;  %901 = vmax.xlane.f32.xlu1 %v900_v29  ;;  %v600_v31 = vpop.f32.mrb[6].mxu0 }
 0x410   : > { %v1941_v32 = vpop.f32.mrb[7].mxu0  ;;  %v1947_v33 = vpop.f32.mrb[7].mxu1 }
 0x415   : > { %v695_v34 = vpop.f32.mrb[8].mxu0  ;;  %v744_v35 = vpop.f32.mrb[8].mxu1 }
 0x416   : > { %v1952_v36 = vpop.f32.mrb[9].mxu0  ;;  %v1958_v37 = vpop.f32.mrb[9].mxu1  ;;  %v906_v38 = vsel %vm507_vm3, %v695_v34, -inf  ;;  %v909_v43 = vsel %vm507_vm3, %v744_v35, -inf }
 0x417   : > { %v747_v39 = vpop.f32.mrb[10].mxu1  ;;  %907 = vmax.xlane.f32.xlu0 %v906_v38  ;;  %v698_v40 = vpop.f32.mrb[10].mxu0 }
 0x418   : > { %v1953_v41 = vpop.f32.mrb[11].mxu0  ;;  %v1959_v42 = vpop.f32.mrb[11].mxu1 }
 0x41b   : > { %910 = vmax.xlane.f32.xlu0 %v909_v43 }
 0x41d   : > { %v793_v44 = vpop.f32.mrb[12].mxu0  ;;  %v842_v46 = vpop.f32.mrb[12].mxu1 }
 0x41e   : > { %v1964_v47 = vpop.f32.mrb[13].mxu0  ;;  %v1970_v50 = vpop.f32.mrb[13].mxu1  ;;  %v915_v51 = vsel %vm507_vm3, %v842_v46, -inf  ;;  %v912_v54 = vsel %vm507_vm3, %v793_v44, -inf }
 0x41f   : > { %v845_v55 = vpop.f32.mrb[14].mxu1  ;;  %916 = vmax.xlane.f32.xlu0 %v915_v51  ;;  %913 = vmax.xlane.f32.xlu1 %v912_v54  ;;  %v796_v58 = vpop.f32.mrb[14].mxu0 }
 0x420   : > { %v1965_v59 = vpop.f32.mrb[15].mxu0  ;;  %v1971_v61 = vpop.f32.mrb[15].mxu1 }
 0x425   : > { %v891_v62 = vpop.f32.mrb[16].mxu0 }
 0x426   : > { %v1976_v63 = vpop.f32.mrb[17].mxu0  ;;  %v918_v0 = vsel %vm507_vm3, %v891_v62, -inf }
 0x427   : > { %919 = vmax.xlane.f32.xlu1 %v918_v0  ;;  %v894_v1 = vpop.f32.mrb[18].mxu0 }
 0x428   : > { %v1977_v4 = vpop.f32.mrb[19].mxu0 }
 0x42f   : > { %v899_v5 = vpop.xlane.xlu0 %898 }
 0x430   : > { %v921_v6 = vsub.f32 %v548_v13, %v899_v5 }
 0x432   : > { %v929_v7 = vmul.f32 1.442695, %v921_v6 }
 0x434   : > { %2106 = vpow2.f32 %v929_v7 }
 0x43e   : > { %v2107_v8 = vpop.eup %2106 }
 0x43f   : > { %v945_v9 = vsel %vm507_vm3, %v2107_v8, 0.0 }
 0x440   : > { %946 = vadd.xlane.f32.xlu0 %v945_v9 }
 0x49c   : > { %v905_v10 = vpop.xlane.xlu0 %904  ;;  %v902_v11 = vpop.xlane.xlu1 %901 }
 0x49d   : > { %v923_v12 = vsub.f32 %v646_v25, %v905_v10  ;;  %v922_v14 = vsub.f32 %v597_v24, %v902_v11 }
 0x49f   : > { %v933_v15 = vmul.f32 1.442695, %v923_v12  ;;  %v931_v16 = vmul.f32 1.442695, %v922_v14 }
 0x4a1   : > { %2108 = vpow2.f32 %v933_v15 }
 0x4a2   : > { %2110 = vpow2.f32 %v931_v16 }
 0x4a4   : > { %v908_v23 = vpop.xlane.xlu0 %907 }
 0x4a5   : > { %v924_v26 = vsub.f32 %v695_v34, %v908_v23 }
 0x4a7   : > { %v935_v27 = vmul.f32 1.442695, %v924_v26 }
 0x4a8   : > { %v911_v28 = vpop.xlane.xlu0 %910 }
 0x4a9   : > { %2112 = vpow2.f32 %v935_v27  ;;  %v925_v13 = vsub.f32 %v744_v35, %v911_v28 }
 0x4ab   : > { %v2109_v29 = vpop.eup %2108  ;;  %v937_v30 = vmul.f32 1.442695, %v925_v13 }
 0x4ac   : > { %v2111_v31 = vpop.eup %2110  ;;  %v917_v32 = vpop.xlane.xlu0 %916  ;;  %v951_v36 = vsel %vm507_vm3, %v2109_v29, 0.0 }
 0x4ad   : > { %v914_v33 = vpop.xlane.xlu1 %913  ;;  %2114 = vpow2.f32 %v937_v30  ;;  %v927_v25 = vsub.f32 %v842_v46, %v917_v32  ;;  %952 = vadd.xlane.f32.xlu0 %v951_v36  ;;  %v948_v37 = vsel %vm507_vm3, %v2111_v31, 0.0 }
 0x4ae   : > { %v926_v24 = vsub.f32 %v793_v44, %v914_v33  ;;  %949 = vadd.xlane.f32.xlu1 %v948_v37 }
 0x4af   : > { %v941_v38 = vmul.f32 1.442695, %v927_v25 }
 0x4b0   : > { %v939_v34 = vmul.f32 1.442695, %v926_v24 }
 0x4b1   : > { %2116 = vpow2.f32 %v941_v38 }
 0x4b2   : > { %2118 = vpow2.f32 %v939_v34 }
 0x4b3   : > { %v2113_v39 = vpop.eup %2112 }
 0x4b4   : > { %v920_v35 = vpop.xlane.xlu1 %919  ;;  %v954_v40 = vsel %vm507_vm3, %v2113_v39, 0.0 }
 0x4b5   : > { %v928_v41 = vsub.f32 %v891_v62, %v920_v35  ;;  %955 = vadd.xlane.f32.xlu1 %v954_v40 }
 0x4b7   : > { %v2115_v42 = vpop.eup %2114  ;;  %v943_v43 = vmul.f32 1.442695, %v928_v41 }
 0x4b8   : > { %v957_v47 = vsel %vm507_vm3, %v2115_v42, 0.0 }
 0x4b9   : > { %2120 = vpow2.f32 %v943_v43  ;;  %958 = vadd.xlane.f32.xlu0 %v957_v47 }
 0x4bb   : > { %v2117_v44 = vpop.eup %2116 }
 0x4bc   : > { %v2119_v46 = vpop.eup %2118  ;;  %v963_v50 = vsel %vm507_vm3, %v2117_v44, 0.0 }
 0x4bd   : > { %964 = vadd.xlane.f32.xlu0 %v963_v50  ;;  %v960_v51 = vsel %vm507_vm3, %v2119_v46, 0.0 }
 0x4be   : > { %961 = vadd.xlane.f32.xlu1 %v960_v51 }
 0x4c3   : > { %v2121_v54 = vpop.eup %2120 }
 0x4c4   : > { %v966_v55 = vsel %vm507_vm3, %v2121_v54, 0.0 }
 0x4c5   : > { %967 = vadd.xlane.f32.xlu1 %v966_v55 }
 0x4cd   : > { %v947_v58 = vpop.xlane.xlu0 %946 }
 0x4ce   : > { %2122 = vrcp.f32 %v947_v58 }
 0x4d8   : > { %v2123_v59 = vpop.eup %2122 }
 0x4d9   : > { %v2520_v61 = vmul.f32 %v2123_v59, %v2107_v8 }
 0x4db   : > { %989 = vst.msk [vmem:[#allocation6] sm:$0xff] (!%p1841_p4), %vm507_vm3, %v2520_v61 }
 0x53a   : > { %v953_v62 = vpop.xlane.xlu0 %952 }
 0x53b   : > { %2124 = vrcp.f32 %v953_v62  ;;  %v950_v63 = vpop.xlane.xlu1 %949 }
 0x53c   : > { %2126 = vrcp.f32 %v950_v63 }
 0x542   : > { %v956_v0 = vpop.xlane.xlu1 %955 }
 0x543   : > { %2128 = vrcp.f32 %v956_v0 }
 0x545   : > { %v2125_v1 = vpop.eup %2124 }
 0x546   : > { %v2127_v4 = vpop.eup %2126  ;;  %v2522_v5 = vmul.f32 %v2125_v1, %v2109_v29  ;;  %v959_v6 = vpop.xlane.xlu0 %958 }
 0x547   : > { %v2524_v7 = vmul.f32 %v2127_v4, %v2111_v31  ;;  %2130 = vrcp.f32 %v959_v6 }
 0x548   : > { %991 = vst.msk [vmem:[#allocation6 + $0x10] sm:$0xff] (!%p1841_p4), %vm507_vm3, %v2522_v5 }
 0x549   : > { %990 = vst.msk [vmem:[#allocation6 + $0x8] sm:$0xff] (!%p1841_p4), %vm507_vm3, %v2524_v7 }
 0x54a   : > { %v965_v9 = vpop.xlane.xlu0 %964 }
 0x54b   : > { %2132 = vrcp.f32 %v965_v9  ;;  %v962_v10 = vpop.xlane.xlu1 %961 }
 0x54c   : > { %2134 = vrcp.f32 %v962_v10 }
 0x54d   : > { %v2129_v8 = vpop.eup %2128 }
 0x54e   : > { %v2526_v11 = vmul.f32 %v2129_v8, %v2113_v39 }
 0x550   : > { %992 = vst.msk [vmem:[#allocation6 + $0x18] sm:$0xff] (!%p1841_p4), %vm507_vm3, %v2526_v11 }
 0x551   : > { %v2131_v12 = vpop.eup %2130 }
 0x552   : > { %v2528_v14 = vmul.f32 %v2131_v12, %v2115_v42  ;;  %v968_v15 = vpop.xlane.xlu1 %967 }
 0x553   : > { %2136 = vrcp.f32 %v968_v15 }
 0x554   : > { %993 = vst.msk [vmem:[#allocation6 + $0x20] sm:$0xff] (!%p1841_p4), %vm507_vm3, %v2528_v14 }
 0x555   : > { %v2133_v16 = vpop.eup %2132 }
 0x556   : > { %v2135_v23 = vpop.eup %2134  ;;  %v2530_v26 = vmul.f32 %v2133_v16, %v2117_v44 }
 0x557   : > { %v2532_v27 = vmul.f32 %v2135_v23, %v2119_v46 }
 0x558   : > { %988 = sbr.rel (%p1841_p4) target bundleno = 1377 (0x561), region = 56  ;;  %995 = vst.msk [vmem:[#allocation6 + $0x30] sm:$0xff] (!%p1841_p4), %vm507_vm3, %v2530_v26 }
 0x559   : > { %994 = vst.msk [vmem:[#allocation6 + $0x28] sm:$0xff] (!%p1841_p4), %vm507_vm3, %v2532_v27 }
 0x55d   : > { %v2137_v28 = vpop.eup %2136 }
 0x55e   : > { %v2534_v13 = vmul.f32 %v2137_v28, %v2121_v54 }
 0x560   : > { %996 = vst.msk [vmem:[#allocation6 + $0x38] sm:$0xff] %vm507_vm3, %v2534_v13 }
 0x561 PF: > { %1978 = vmatprep.subr.bf16.mxu1 %v2268_v20  ;;  %1980 = vmatprep.mubr.msk.bf16.mxu1 %vm2269_vm2, %v2268_v20  ;;  %s2274_s21 = smov 64   ;;  %vm1010_vm4 = vcmask 1043456   ;;  %v997_v30 = vpack.c.bf16 %v2520_v61, %v2520_v61  ;;  %v999_v32 = vpack.c.bf16 %v2522_v5, %v2522_v5  ;;  %v1000_v25 = vpack.c.bf16 %v2526_v11, %v2526_v11  ;;  %v2153_v4 = vld [vmem:[%s2377_s29] sm:$0xff]   ;;  %v2154_v10 = vld [vmem:[%s2377_s29 + $0x8] sm:$0xff]   ;;  %s2275_s22 = smov 8  }
 0x562   : > { %1005 = vrot.lane.b32.xlu0 %v2438_v45, %s2274_s21  ;;  %1102 = vrot.lane.b32.xlu1 %v2441_v48, %s2274_s21  ;;  %v1001_v38 = vpack.c.bf16 %v2528_v14, %v2528_v14  ;;  %v1002_v35 = vpack.c.bf16 %v2532_v27, %v2532_v27  ;;  %v1003_v41 = vpack.c.bf16 %v2530_v26, %v2530_v26  ;;  %s2276_s23 = smov 16   ;;  %s2277_s26 = smov 24   ;;  %vm1416_vm5 = vcmask 130048  }
 0x563   : > { %1984 = vmatprep.subr.bf16.mxu0 %v2268_v20  ;;  %1986 = vmatprep.mubr.msk.bf16.mxu0 %vm2269_vm2, %v2268_v20  ;;  %v1004_v42 = vpack.c.bf16 %v2534_v13, %v2534_v13  ;;  %vm1419_vm6 = vcmask 195584   ;;  %vm1631_vm7 = vcmask 523264   ;;  %p2072_p6 = scmp.eq.s32.totalorder %s2327_s25, 1  ;;  %s2278_s27 = smov [#allocation6]  }
 0x564   : > { %s1699_s28 = sshll.u32 %s2278_s27, 4  ;;  %s1700_s28 = int_to_ptr.vmem [resolvable:$true] %s1699_s28 }
 0x565   : > { %s2193_s29 = scalar_lea.vmem %s1700_s28, 1024  ;;  %p2200_p13 = scmp.lt.s32.totalorder %s1700_s28, %s1700_s28 }
 0x566   : > { %1054 = vrot.lane.b32.xlu0 %v2443_v49, %s2274_s21  ;;  %1150 = vrot.lane.b32.xlu1 %v2447_v52, %s2274_s21  ;;  %p2194_p10 = scmp.ne.s32.totalorder %s1700_s28, %s2193_s29  ;;  %p2201_p0 = scmp.lt.s32.totalorder %s2193_s29, %s2193_s29 }
 0x568   : > { %p2195_p11 = pnand %p2194_p10, %p2072_p6  ;;  %p2202_p1 = por %p2201_p0, %p2200_p13 }
 0x56a   : > { %1198 = vrot.lane.b32.xlu0 %v2449_v53, %s2274_s21  ;;  %1246 = vrot.lane.b32.xlu1 %v2455_v57, %s2274_s21  ;;  %v998_v57 = vpack.c.bf16 %v2524_v7, %v2524_v7  ;;  %p2196_p12 = pneg %p2195_p11 }
 0x56c   : > { %p2203_p5 = pnand %p2202_p1, %p2196_p12 }
 0x56e   : > { %1294 = vrot.lane.b32.xlu0 %v2453_v56, %s2274_s21  ;;  %1342 = vrot.lane.b32.xlu1 %v2461_v60, %s2274_s21 }
 0x5d4   : > { %v1006_v45 = vpop.permute.xlu0 %1005  ;;  %v1103_v48 = vpop.permute.xlu1 %1102 }
 0x5d5   : > { %v1012_v29 = vsel %vm1010_vm4, %v1006_v45, 0  ;;  %v1108_v49 = vsel %vm1010_vm4, %v1103_v48, 0 }
 0x5d6   : > { %1979 = vmatpush3.bf16.msra.mxu1 %v1012_v29 }
 0x5d7   : > { %1990 = vmatprep.subr.bf16.mxu1 %v2268_v20 }
 0x5d8   : > { %v1055_v52 = vpop.permute.xlu0 %1054  ;;  %v1151_v53 = vpop.permute.xlu1 %1150 }
 0x5d9   : > { %1981 = vmatmul.mubr.msk.bf16.vlgmr.msra.gmra.mrb[16].mxu1 %vm507_vm3, %v997_v30  ;;  %v1060_v56 = vsel %vm1010_vm4, %v1055_v52, 0  ;;  %v1156_v60 = vsel %vm1010_vm4, %v1151_v53, 0 }
 0x5da   : > { %1985 = vmatpush3.bf16.msra.mxu0 %v1060_v56  ;;  %1991 = vmatpush3.bf16.msra.mxu1 %v1108_v49 }
 0x5db   : > { %1996 = vmatprep.subr.bf16.mxu0 %v2268_v20  ;;  %1992 = vmatprep.mubr.msk.bf16.mxu1 %vm2269_vm2, %v2268_v20 }
 0x5dc   : > { %v1199_v31 = vpop.permute.xlu0 %1198  ;;  %2002 = vmatprep.subr.bf16.mxu1 %v2268_v20  ;;  %v1247_v36 = vpop.permute.xlu1 %1246 }
 0x5dd   : > { %1987 = vmatmul.mubr.msk.bf16.vlgmr.msra.gmra.mrb[20].mxu0 %vm507_vm3, %v998_v57  ;;  %v1204_v33 = vsel %vm1010_vm4, %v1199_v31, 0  ;;  %v1252_v24 = vsel %vm1010_vm4, %v1247_v36, 0 }
 0x5de   : > { %1997 = vmatpush3.bf16.msra.mxu0 %v1156_v60  ;;  %1998 = vmatprep.mubr.msk.bf16.mxu0 %vm2269_vm2, %v2268_v20 }
 0x5df   : > { %2008 = vmatprep.subr.bf16.mxu0 %v2268_v20 }
 0x5e0   : > { %v1295_v37 = vpop.permute.xlu0 %1294  ;;  %v1343_v39 = vpop.permute.xlu1 %1342 }
 0x5e1   : > { %1993 = vmatmul.mubr.msk.bf16.vlgmr.msra.gmra.mrb[20].mxu1 %vm507_vm3, %v999_v32  ;;  %v1300_v34 = vsel %vm1010_vm4, %v1295_v37, 0  ;;  %v1348_v40 = vsel %vm1010_vm4, %v1343_v39, 0 }
 0x5e2   : > { %2003 = vmatpush3.bf16.msra.mxu1 %v1204_v33  ;;  %2004 = vmatprep.mubr.msk.bf16.mxu1 %vm2269_vm2, %v2268_v20 }
 0x5e3   : > { %2014 = vmatprep.subr.bf16.mxu1 %v2268_v20 }
 0x5e5   : > { %1999 = vmatmul.mubr.msk.bf16.vlgmr.msra.gmra.mrb[24].mxu0 %vm507_vm3, %v1000_v25 }
 0x5e6   : > { %2009 = vmatpush3.bf16.msra.mxu0 %v1252_v24  ;;  %2010 = vmatprep.mubr.msk.bf16.mxu0 %vm2269_vm2, %v2268_v20 }
 0x5e7   : > { %2020 = vmatprep.subr.bf16.mxu0 %v2268_v20 }
 0x5e9   : > { %2005 = vmatmul.mubr.msk.bf16.vlgmr.msra.gmra.mrb[24].mxu1 %vm507_vm3, %v1001_v38 }
 0x5ea   : > { %2015 = vmatpush3.bf16.msra.mxu1 %v1300_v34  ;;  %2016 = vmatprep.mubr.msk.bf16.mxu1 %vm2269_vm2, %v2268_v20 }
 0x5eb   : > { %2026 = vmatprep.subr.bf16.mxu1 %v2268_v20 }
 0x5ed   : > { %2011 = vmatmul.mubr.msk.bf16.vlgmr.msra.gmra.mrb[28].mxu0 %vm507_vm3, %v1002_v35 }
 0x5ee   : > { %2021 = vmatpush3.bf16.msra.mxu0 %v1348_v40  ;;  %2022 = vmatprep.mubr.msk.bf16.mxu0 %vm2269_vm2, %v2268_v20 }
 0x5ef   : > { %2034 = vmatprep.subr.bf16.mxu0 %v2268_v20 }
 0x5f1   : > { %2017 = vmatmul.mubr.msk.bf16.vlgmr.msra.gmra.mrb[28].mxu1 %vm507_vm3, %v1003_v41 }
 0x5f2   : > { %2030 = vmatprep.mubr.msk.bf16.mxu1 %vm2269_vm2, %v2268_v20  ;;  %2027 = vmatpush3.bf16.msra.mxu1 %v2153_v4  ;;  %v2156_v4 = vld [vmem:[%s2382_s9 + $0x8] sm:$0xff]  }
 0x5f3   : > { %2028 = vmatprep.subr.bf16.mxu1 %v2268_v20 }
 0x5f5   : > { %2023 = vmatmul.mubr.msk.bf16.vlgmr.msra.gmra.mrb[32].mxu0 %vm507_vm3, %v1004_v42 }
 0x5f6   : > { %2038 = vmatprep.mubr.msk.bf16.mxu0 %vm2269_vm2, %v2268_v20  ;;  %2029 = vmatpush3.bf16.msra.mxu1 %v2154_v10 }
 0x5f7   : > { %2042 = vmatprep.subr.bf16.mxu1 %v2268_v20 }
 0x6ac   : > { %v1048_v43 = vpop.f32.mrb[16].mxu1 }
 0x6ad   : > { %v1982_v47 = vpop.f32.mrb[17].mxu1 }
 0x6ae   : > { %v1051_v44 = vpop.f32.mrb[18].mxu1 }
 0x6af   : > { %v1983_v46 = vpop.f32.mrb[19].mxu1 }
 0x6b0   : > { %v1096_v50 = vpop.f32.mrb[20].mxu0 }
 0x6b1   : > { %v1988_v51 = vpop.f32.mrb[21].mxu0 }
 0x6b2   : > { %v1099_v54 = vpop.f32.mrb[22].mxu0 }
 0x6b3   : > { %v1989_v55 = vpop.f32.mrb[23].mxu0 }
 0x6b4   : > { %v1144_v58 = vpop.f32.mrb[20].mxu1 }
 0x6b5   : > { %v1994_v59 = vpop.f32.mrb[21].mxu1 }
 0x6b6   : > { %v1147_v61 = vpop.f32.mrb[22].mxu1 }
 0x6b7   : > { %v1995_v62 = vpop.f32.mrb[23].mxu1 }
 0x6b8   : > { %v1192_v63 = vpop.f32.mrb[24].mxu0 }
 0x6b9   : > { %v2000_v0 = vpop.f32.mrb[25].mxu0 }
 0x6ba   : > { %v1195_v1 = vpop.f32.mrb[26].mxu0 }
 0x6bb   : > { %v2001_v5 = vpop.f32.mrb[27].mxu0  ;;  %v2155_v1 = vld [vmem:[%s2382_s9] sm:$0xff]  }
 0x6bc   : > { %v1240_v6 = vpop.f32.mrb[24].mxu1  ;;  %2035 = vmatpush3.bf16.msra.mxu0 %v2155_v1  ;;  %v2157_v5 = vld [vmem:[%s2387_s12] sm:$0xff]  }
 0x6bd   : > { %v2006_v7 = vpop.f32.mrb[25].mxu1  ;;  %2036 = vmatprep.subr.bf16.mxu0 %v2268_v20 }
 0x6be   : > { %v1243_v9 = vpop.f32.mrb[26].mxu1 }
 0x6bf   : > { %v2007_v8 = vpop.f32.mrb[27].mxu1 }
 0x6c0   : > { %v1288_v11 = vpop.f32.mrb[28].mxu0  ;;  %2037 = vmatpush3.bf16.msra.mxu0 %v2156_v4 }
 0x6c1   : > { %v2138_v12 = vpack.i.bf16 %v1288_v11, %v1096_v50  ;;  %v2012_v14 = vpop.f32.mrb[29].mxu0 }
 0x6c2   : > { %v1291_v15 = vpop.f32.mrb[30].mxu0 }
 0x6c3   : > { %2139 = vrot.lane.b32.xlu0 %v2138_v12, %s2275_s22  ;;  %v2013_v16 = vpop.f32.mrb[31].mxu0 }
 0x6c4   : > { %v1336_v23 = vpop.f32.mrb[28].mxu1 }
 0x6c5   : > { %v2143_v26 = vpack.i.bf16 %v1336_v23, %v1144_v58  ;;  %v2018_v27 = vpop.f32.mrb[29].mxu1 }
 0x6c6   : > { %v1339_v28 = vpop.f32.mrb[30].mxu1 }
 0x6c7   : > { %2144 = vrot.lane.b32.xlu1 %v2143_v26, %s2276_s23  ;;  %v2019_v13 = vpop.f32.mrb[31].mxu1 }
 0x6c8   : > { %v1384_v45 = vpop.f32.mrb[32].mxu0 }
 0x6c9   : > { %v2148_v48 = vpack.i.bf16 %v1384_v45, %v1192_v63  ;;  %v2024_v29 = vpop.f32.mrb[33].mxu0 }
 0x6ca   : > { %v1387_v30 = vpop.f32.mrb[34].mxu0  ;;  %v2160_v29 = vld [vmem:[%s2387_s12 + $0x18] sm:$0xff]  }
 0x6cb   : > { %2149 = vrot.lane.b32.xlu0 %v2148_v48, %s2277_s26  ;;  %v2025_v49 = vpop.f32.mrb[35].mxu0  ;;  %v2159_v48 = vld [vmem:[%s2387_s12 + $0x10] sm:$0xff]  }
 0x735   : > { %v2140_v52 = vpop.permute.xlu0 %2139 }
 0x736   : > { %v2142_v56 = vunpack.i.h.bf16 %v2140_v52  ;;  %v2141_v57 = vunpack.i.l.bf16 %v2140_v52 }
 0x738   : > { %v1414_v33 = vsel %vm507_vm3, %v1048_v43, %v2141_v57  ;;  %v1415_v36 = vsel %vm507_vm3, %v1240_v6, %v2142_v56  ;;  %v2158_v6 = vld [vmem:[%s2387_s12 + $0x8] sm:$0xff]  }
 0x739   : > { %v2145_v53 = vpop.permute.xlu1 %2144 }
 0x73a   : > { %v2147_v60 = vunpack.i.h.bf16 %v2145_v53  ;;  %v2146_v31 = vunpack.i.l.bf16 %v2145_v53 }
 0x73c   : > { %v1418_v37 = vsel %vm1416_vm5, %v1415_v36, %v2147_v60  ;;  %v1417_v38 = vsel %vm1416_vm5, %v1414_v33, %v2146_v31 }
 0x73d   : > { %v2150_v32 = vpop.permute.xlu0 %2149 }
 0x73e   : > { %v2152_v25 = vunpack.i.h.bf16 %v2150_v32  ;;  %v2151_v24 = vunpack.i.l.bf16 %v2150_v32 }
 0x740   : > { %v1420_v34 = vsel %vm1419_vm6, %v1417_v38, %v2151_v24  ;;  %v1421_v39 = vsel %vm1419_vm6, %v1418_v37, %v2152_v25 }
 0x741   : > { %v1422_v35 = vpack.c.bf16 %v1421_v39, %v1420_v34 }
 0x743   : > { %2031 = vmatmul.mubr.msk.bf16.vlgmr.msra.gmra.mrb[32].mxu1 %vm375_vm1, %v1422_v35 }
 0x744   : > { %2050 = vmatprep.mubr.msk.bf16.mxu1 %vm2269_vm2, %v2268_v20  ;;  %2043 = vmatpush3.bf16.msra.mxu1 %v2157_v5 }
 0x745   : > { %2044 = vmatprep.subr.bf16.mxu1 %v2268_v20 }
 0x748   : > { %2045 = vmatpush3.bf16.msra.mxu1 %v2158_v6 }
 0x749   : > { %2046 = vmatprep.subr.bf16.mxu1 %v2268_v20 }
 0x74c   : > { %2047 = vmatpush3.bf16.msra.mxu1 %v2159_v48 }
 0x74d   : > { %2048 = vmatprep.subr.bf16.mxu1 %v2268_v20 }
 0x750   : > { %2049 = vmatpush3.bf16.msra.mxu1 %v2160_v29 }
 0x816   : > { %v1480_v40 = vpop.f32.mrb[32].mxu1 }
 0x817   : > { %v1481_v41 = vadd.f32 %v2416_v19, %v1480_v40  ;;  %v2032_v42 = vpop.f32.mrb[33].mxu1 }
 0x818   : > { %v1483_v47 = vpop.f32.mrb[34].mxu1 }
 0x819   : > { %v2635_v43 = vadd.f32 %v1481_v41, %v2396_v2  ;;  %v1484_v44 = vadd.f32 %v2416_v19, %v1483_v47  ;;  %v2033_v46 = vpop.f32.mrb[35].mxu1 }
 0x81b   : > { %v2639_v50 = vadd.f32 %v1484_v44, %v2398_v3  ;;  %v1489_v51 = vsel %vm375_vm1, %v2635_v43, 0.0 }
 0x81c   : > { %1490 = vadd.xlane.f32.xlu1 %v1489_v51 }
 0x81d   : > { %v1492_v54 = vsel %vm375_vm1, %v2639_v50, 0.0 }
 0x81e   : > { %1493 = vadd.xlane.f32.xlu0 %v1492_v54 }
 0x8a9   : > { %v1491_v55 = vpop.xlane.xlu1 %1490 }
 0x8aa   : > { %v1495_v58 = vmul.f32 0.03125, %v1491_v55 }
 0x8ab   : > { %v1494_v2 = vpop.xlane.xlu0 %1493 }
 0x8ac   : > { %v1497_v19 = vsub.f32 %v2635_v43, %v1495_v58  ;;  %v1496_v59 = vmul.f32 0.03125, %v1494_v2 }
 0x8ae   : > { %v1498_v3 = vsub.f32 %v2639_v50, %v1496_v59  ;;  %v1499_v61 = vmul.f32 %v1497_v19, %v1497_v19 }
 0x8b0   : > { %v1501_v62 = vsel %vm375_vm1, %v1499_v61, 0.0  ;;  %v1500_v63 = vmul.f32 %v1498_v3, %v1498_v3 }
 0x8b1   : > { %1502 = vadd.xlane.f32.xlu0 %v1501_v62 }
 0x8b2   : > { %v1504_v0 = vsel %vm375_vm1, %v1500_v63, 0.0 }
 0x8b3   : > { %1505 = vadd.xlane.f32.xlu1 %v1504_v0 }
 0x93e   : > { %v1503_v7 = vpop.xlane.xlu0 %1502 }
 0x93f   : > { %v1507_v9 = vmul.f32 0.03125, %v1503_v7 }
 0x940   : > { %v1506_v10 = vpop.xlane.xlu1 %1505 }
 0x941   : > { %v1509_v8 = vadd.f32 1e-05, %v1507_v9  ;;  %v1508_v11 = vmul.f32 0.03125, %v1506_v10 }
 0x943   : > { %2161 = vrsqrt.f32 %v1509_v8  ;;  %v1510_v12 = vadd.f32 1e-05, %v1508_v11 }
 0x945   : > { %2163 = vrsqrt.f32 %v1510_v12 }
 0x94d   : > { %v2162_v14 = vpop.eup %2161 }
 0x94e   : > { %v1513_v15 = vmul.f32 %v2162_v14, %v1497_v19 }
 0x94f   : > { %v2164_v16 = vpop.eup %2163 }
 0x950   : > { %v1514_v23 = vmul.f32 %v2164_v16, %v1498_v3  ;;  %v1519_v26 = vmul.f32 %v2410_v17, %v1513_v15 }
 0x952   : > { %v1520_v27 = vmul.f32 %v2410_v17, %v1514_v23  ;;  %v1525_v28 = vadd.f32 %v2413_v18, %v1519_v26 }
 0x954   : > { %v1526_v13 = vadd.f32 %v2413_v18, %v1520_v27 }
 0x956   : > { %v1527_v45 = vpack.c.bf16 %v1526_v13, %v1525_v28 }
 0x958   : > { %2039 = vmatmul.mubr.msk.bf16.vlgmr.msra.gmra.mrb[36].mxu0 %vm375_vm1, %v1527_v45 }
 0xa2b   : > { %v1585_v30 = vpop.f32.mrb[36].mxu0 }
 0xa2c   : > { %v1586_v49 = vadd.f32 %v2424_v22, %v1585_v30  ;;  %v2040_v52 = vpop.f32.mrb[37].mxu0 }
 0xa2d   : > { %v1588_v17 = vpop.f32.mrb[38].mxu0 }
 0xa2e   : > { %v1589_v53 = vadd.f32 %v2424_v22, %v1588_v17  ;;  %v2041_v56 = vpop.f32.mrb[39].mxu0  ;;  %v1592_v18 = vmax.f32 %v1586_v49, 0.0 }
 0xa30   : > { %v1593_v57 = vmax.f32 %v1589_v53, 0.0 }
 0xa32   : > { %v1594_v60 = vpack.c.bf16 %v1593_v57, %v1592_v18 }
 0xa34   : > { %2051 = vmatmul.mubr.msk.bf16.vlgmr.msra.gmra.mrb[36].mxu1 %vm1631_vm7, %v1594_v60 }
 0xa35   : > { %2206 = shalt.err (!%p2203_p5)
}
 0xa36   : > { %s2207_s9 = scalar_lea.hbm %s2733_s7, 1024 }
 0xa37   : > { %p2208_p7 = scmp.ne.s32.totalorder %s2733_s7, %s2207_s9  ;;  %p2213_p2 = scmp.lt.u32.totalorder %s2207_s9, %s2733_s7 }
 0xa39   : > { %p2209_p9 = pnand %p2208_p7, %p2072_p6 }
 0xa3b   : > { %p2210_p8 = pneg %p2209_p9 }
 0xa3d   : > { %p2215_p3 = pnand %p2213_p2, %p2210_p8 }
 0xa3f   : > { %2218 = shalt.err (!%p2215_p3)
}
 0xa40   : > { %s2279_s14 = smov 128   ;;  %s2280_s17 = smov [#allocation5]  }
 0xa41   : > { %2061 = dma.vmem_to_hbm [thread:$0]  (%p2072_p6), %s1700_s28, 1024, %s2733_s7, [#allocation7], %s2279_s14, %s2279_s14, %s2275_s22  }
 0xa42   : > { %s1686_s18 = sshll.u32 %s2280_s17, 4  ;;  %s1687_s18 = int_to_ptr.vmem [resolvable:$true] %s1686_s18 }
 0xa43   : > { %s2219_s19 = scalar_lea.vmem %s1687_s18, 256  ;;  %p2226_p12 = scmp.lt.s32.totalorder %s1687_s18, %s1687_s18 }
 0xa44   : > { %p2220_p4 = scmp.ne.s32.totalorder %s1687_s18, %s2219_s19  ;;  %p2227_p13 = scmp.lt.s32.totalorder %s2219_s19, %s2219_s19 }
 0xa46   : > { %p2221_p10 = pnand %p2220_p4, %p2072_p6  ;;  %p2228_p0 = por %p2227_p13, %p2226_p12 }
 0xa48   : > { %p2222_p11 = pneg %p2221_p10 }
 0xa4a   : > { %p2229_p1 = pnand %p2228_p0, %p2222_p11 }
 0xb07   : > { %v1669_v20 = vpop.f32.mrb[36].mxu1 }
 0xb08   : > { %v1670_v22 = vadd.f32 %v2421_v21, %v1669_v20  ;;  %v2052_v31 = vpop.f32.mrb[37].mxu1 }
 0xb09   : > { %v1672_v32 = vpop.f32.mrb[38].mxu1 }
 0xb0a   : > { %v1676_v33 = vadd.f32 %v1670_v22, %v2635_v43  ;;  %v1673_v36 = vadd.f32 %v2421_v21, %v1672_v32  ;;  %v2053_v25 = vpop.f32.mrb[39].mxu1 }
 0xb0c   : > { %1678 = vst.msk [vmem:[#allocation5] sm:$0xff] %vm375_vm1, %v1676_v33  ;;  %v1677_v24 = vadd.f32 %v1673_v36, %v2639_v50 }
 0xb0e   : > { %1679 = vst.msk [vmem:[#allocation5 + $0x8] sm:$0xff] %vm375_vm1, %v1677_v24 }
 0xb0f   : > { %2232 = shalt.err (!%p2229_p1)
}
 0xb10   : > { %s2233_s23 = scalar_lea.hbm %s2732_s6, 256 }
 0xb11   : > { %p2234_p5 = scmp.ne.s32.totalorder %s2732_s6, %s2233_s23  ;;  %p2239_p8 = scmp.lt.u32.totalorder %s2233_s23, %s2732_s6 }
 0xb13   : > { %p2235_p7 = pnand %p2234_p5, %p2072_p6 }
 0xb15   : > { %p2236_p9 = pneg %p2235_p7 }
 0xb17   : > { %p2241_p2 = pnand %p2239_p8, %p2236_p9 }
 0xb19   : > { %2244 = shalt.err (!%p2241_p2)
}
 0xb1a   : > { %2059 = dma.vmem_to_hbm [thread:$0]  (%p2072_p6), %s1687_s18, 256, %s2732_s6, [#allocation4], %s2279_s14, %s2279_s14, %s2275_s22  }
 0xb1b   : > { %2254 = dma.done.wait (%p2072_p6), [#allocation4], 256  }
 0xb1c   : > { %2256 = vsyncadd (%p2072_p6), [#allocation4], 4294967040 }
 0xb1d   : > { %2258 = dma.done.wait (%p2072_p6), [#allocation7], 1024  }
 0xb1e   : > { %2260 = vsyncadd (%p2072_p6), [#allocation7], 4294966272 }
 0xb1f PF: > { %s21_s24 = sadd.s32 1, %s2263_s24  }
 0xb20   : > { %p18_p3 = scmp.ge.s32.totalorder %s21_s24, 4  }
 0xb22   :  { %20 = sbr.rel (!%p18_p3) target bundleno = 3 (0x3), region = 104 }
 0xb29   :  { %1719 = vsyncpa [#allocation3], 1 }
 0xb2a   :  { %1721 = vsyncpa [#allocation3 + $0x1], 1 }
 0xb2b   :  { %1722 = vsyncpa [#allocation4], 1 }
 0xb2c   :  { %1724 = vsyncpa [#allocation4 + $0x1], 1 }
 0xb2d   :  { %1725 = vsyncpa [#allocation7], 1 }

</bundles_post_ra>
